<compile_context>
chip_gen: v7x
topology: tpu7x:2x2x1
jax: 0.10.0
libtpu: 0.0.40
codegen_flags: <defaults>
</compile_context>

<pallas_src>
import jax
import jax.numpy as jnp
from jax.experimental import pallas as pl
from jax.experimental.pallas import tpu as pltpu

_LANE = 128
_SUBLANE = 8
_NEG = -1e30  # finite "-inf" for padded action logits (avoids inf-inf NaNs)


def _round_up(n, m):
    return ((n + m - 1) // m) * m


def actor_kernel(x_ref, g_ref, we_ref, be_ref, w1_ref, b1_ref, w2_ref, b2_ref,
                 act_ref, logp_ref, probs_ref):
    x = x_ref[...]

    # ---- encoder: Linear(in, enc_out) + ReLU  (detach is a forward no-op)
    h = jnp.dot(x, we_ref[...], preferred_element_type=jnp.float32) + be_ref[...]
    h = jnp.maximum(h, 0.0)

    # ---- trunk: Linear(enc_out, num_features) -> ReLU -> Linear(num_features, A)
    h1 = jnp.dot(h, w1_ref[...], preferred_element_type=jnp.float32) + b1_ref[...]
    h1 = jnp.maximum(h1, 0.0)
    logits = jnp.dot(h1, w2_ref[...], preferred_element_type=jnp.float32) + b2_ref[...]
    # padded action columns carry bias = _NEG -> prob ~ 0, never sampled

    # ---- log_softmax / softmax: single exp pass shared between both outputs
    m = jnp.max(logits, axis=1, keepdims=True)
    z = logits - m
    e = jnp.exp(z)
    s = jnp.sum(e, axis=1, keepdims=True)
    logp_ref[...] = z - jnp.log(s)
    probs_ref[...] = e / s

    # ---- Categorical(logits).sample() via Gumbel-max (noise streamed in)
    pert = logits + g_ref[...]
    b, a = pert.shape
    col = jax.lax.broadcasted_iota(jnp.int32, (b, a), 1)
    pmax = jnp.max(pert, axis=1, keepdims=True)
    # first index attaining the max (torch-argmax tie-break semantics)
    first = jnp.min(jnp.where(pert == pmax, col, a), axis=1, keepdims=True)
    act_ref[...] = jnp.broadcast_to(first, act_ref.shape)  # lane-dense int32 slab


def actor_forward(x, params, key, *, block_b=256):
    """Returns (action[B], log_prob[B, A], action_probs[B, A])."""
    B, d_in = x.shape
    enc_out = params["we"].shape[1]
    num_features = params["w1"].shape[1]
    num_actions = params["w2"].shape[1]

    # Pad every feature axis to a lane multiple (zero padding is semantics-
    # preserving through Linear+ReLU; padded action columns are masked via a
    # -1e30 bias).  Pad batch to a multiple of the batch tile.
    d_p = _round_up(d_in, _LANE)
    e_p = _round_up(enc_out, _LANE)
    f_p = _round_up(num_features, _LANE)
    a_p = _round_up(num_actions, _LANE)

    tb = max(_SUBLANE, min(block_b, _round_up(B, _SUBLANE)))
    b_p = _round_up(B, tb)

    def pad2(arr, rows, cols, fill=0.0):
        r, c = arr.shape
        return jnp.pad(arr, ((0, rows - r), (0, cols - c)), constant_values=fill)

    xp = pad2(x.astype(jnp.float32), b_p, d_p)
    we = pad2(params["we"], d_p, e_p)
    be = pad2(params["be"], 1, e_p)
    w1 = pad2(params["w1"], e_p, f_p)
    b1 = pad2(params["b1"], 1, f_p)
    w2 = pad2(params["w2"], f_p, a_p)
    b2 = pad2(params["b2"], 1, a_p, fill=_NEG)   # only action columns are padded here

    # Gumbel noise generated once in the wrapper (portable across TPU + interpret).
    u = jax.random.uniform(key, (b_p, a_p), jnp.float32,
                           minval=1e-7, maxval=1.0 - 1e-7)
    gumbel = -jnp.log(-jnp.log(u))

    const = lambda i: (0, 0)   # weights stay resident across the batch grid
    row = lambda i: (i, 0)

    action_slab, logp_p, probs_p = pl.pallas_call(
        actor_kernel,
        grid=(b_p // tb,),
        in_specs=[
            pl.BlockSpec((tb, d_p), row),                        # x tile
            pl.BlockSpec((tb, a_p), row),                        # gumbel noise tile
            pl.BlockSpec((d_p, e_p), const),                     # we (VMEM-resident)
            pl.BlockSpec((1, e_p), const),                       # be
            pl.BlockSpec((e_p, f_p), const),                     # w1
            pl.BlockSpec((1, f_p), const),                       # b1
            pl.BlockSpec((f_p, a_p), const),                     # w2
            pl.BlockSpec((1, a_p), const),                       # b2
        ],
        out_specs=(
            pl.BlockSpec((tb, _LANE), row),                      # action slab
            pl.BlockSpec((tb, a_p), row),                        # log_prob
            pl.BlockSpec((tb, a_p), row),                        # action_probs
        ),
        out_shape=(
            jax.ShapeDtypeStruct((b_p, _LANE), jnp.int32),
            jax.ShapeDtypeStruct((b_p, a_p), jnp.float32),
            jax.ShapeDtypeStruct((b_p, a_p), jnp.float32),
        ),
        compiler_params=pltpu.CompilerParams(
            dimension_semantics=("parallel",)),                  # megacore on v7x
    )(xp, gumbel, we, be, w1, b1, w2, b2)

    return (action_slab[:B, 0],
            logp_p[:B, :num_actions],
            probs_p[:B, :num_actions])


def init_params(key, d_in, enc_out, num_features, num_actions):
    ks = jax.random.split(key, 6)
    scale = 0.05
    return {
        "we": scale * jax.random.normal(ks[0], (d_in, enc_out), jnp.float32),
        "be": scale * jax.random.normal(ks[1], (1, enc_out), jnp.float32),
        "w1": scale * jax.random.normal(ks[2], (enc_out, num_features), jnp.float32),
        "b1": scale * jax.random.normal(ks[3], (1, num_features), jnp.float32),
        "w2": scale * jax.random.normal(ks[4], (num_features, num_actions), jnp.float32),
        "b2": scale * jax.random.normal(ks[5], (1, num_actions), jnp.float32),
    }


if __name__ == "__main__":
    # Small, deliberately lane/sublane-unaligned shapes to exercise the padding path.
    B, D_IN, ENC_OUT, NUM_FEATURES, NUM_ACTIONS = 50, 24, 40, 96, 6

    key = jax.random.PRNGKey(0)
    k_x, k_p, k_s = jax.random.split(key, 3)
    x = jax.random.normal(k_x, (B, D_IN), jnp.float32)
    params = init_params(k_p, D_IN, ENC_OUT, NUM_FEATURES, NUM_ACTIONS)

    action, log_prob, action_probs = actor_forward(x, params, k_s, block_b=16)
    jax.block_until_ready((action, log_prob, action_probs))

    # shape / semantics checks (match the PyTorch forward contract)
    assert action.shape == (B,)
    assert log_prob.shape == (B, NUM_ACTIONS)
    assert action_probs.shape == (B, NUM_ACTIONS)
    assert bool(jnp.all((action >= 0) & (action < NUM_ACTIONS)))
    assert jnp.allclose(jnp.sum(action_probs, axis=1), 1.0, atol=1e-5)

    # pure-JAX reference for log_softmax / probs parity
    h_ref = jnp.maximum(x @ params["we"] + params["be"], 0.0)
    h1_ref = jnp.maximum(h_ref @ params["w1"] + params["b1"], 0.0)
    logits_ref = h1_ref @ params["w2"] + params["b2"]
    logp_ref = jax.nn.log_softmax(logits_ref, axis=1)
    assert jnp.allclose(log_prob, logp_ref, atol=1e-2)
    assert jnp.allclose(action_probs, jnp.exp(logp_ref), atol=1e-2)

    print("KERNEL_OK")
</pallas_src>

<mosaic_0001>
module attributes {stable_mosaic.version = 11 : i64} {
  func.func @actor_kernel(%arg0: i32, %arg1: memref<16x128xf32, #tpu.memory_space<vmem>>, %arg2: memref<16x128xf32, #tpu.memory_space<vmem>>, %arg3: memref<128x128xf32, #tpu.memory_space<vmem>>, %arg4: memref<1x128xf32, #tpu.memory_space<vmem>>, %arg5: memref<128x128xf32, #tpu.memory_space<vmem>>, %arg6: memref<1x128xf32, #tpu.memory_space<vmem>>, %arg7: memref<128x128xf32, #tpu.memory_space<vmem>>, %arg8: memref<1x128xf32, #tpu.memory_space<vmem>>, %arg9: memref<16x128xi32, #tpu.memory_space<vmem>>, %arg10: memref<16x128xf32, #tpu.memory_space<vmem>>, %arg11: memref<16x128xf32, #tpu.memory_space<vmem>>) attributes {dimension_semantics = [#tpu.dimension_semantics<parallel>], iteration_bounds = array<i64: 4>, scalar_prefetch = 0 : i64, scratch_operands = 0 : i64, tpu.core_type = #tpu.core_type<tc>, window_params = [{transform_indices = @transform_0, window_bounds = array<i64: 16, 128>}, {transform_indices = @transform_1, window_bounds = array<i64: 16, 128>}, {pipeline_mode = #tpu.pipeline_mode<synchronous>, transform_indices = @transform_2, window_bounds = array<i64: 128, 128>}, {pipeline_mode = #tpu.pipeline_mode<synchronous>, transform_indices = @transform_3, window_bounds = array<i64: 1, 128>}, {pipeline_mode = #tpu.pipeline_mode<synchronous>, transform_indices = @transform_4, window_bounds = array<i64: 128, 128>}, {pipeline_mode = #tpu.pipeline_mode<synchronous>, transform_indices = @transform_5, window_bounds = array<i64: 1, 128>}, {pipeline_mode = #tpu.pipeline_mode<synchronous>, transform_indices = @transform_6, window_bounds = array<i64: 128, 128>}, {pipeline_mode = #tpu.pipeline_mode<synchronous>, transform_indices = @transform_7, window_bounds = array<i64: 1, 128>}, {transform_indices = @transform_8, window_bounds = array<i64: 16, 128>}, {transform_indices = @transform_9, window_bounds = array<i64: 16, 128>}, {transform_indices = @transform_10, window_bounds = array<i64: 16, 128>}]} {
    %c0 = arith.constant 0 : index
    %c0_0 = arith.constant 0 : index
    %0 = vector.load %arg1[%c0, %c0_0] : memref<16x128xf32, #tpu.memory_space<vmem>>, vector<16x128xf32>
    %c0_1 = arith.constant 0 : index
    %c0_2 = arith.constant 0 : index
    %1 = vector.load %arg3[%c0_1, %c0_2] : memref<128x128xf32, #tpu.memory_space<vmem>>, vector<128x128xf32>
    %cst = arith.constant dense<0.000000e+00> : vector<16x128xf32>
    %2 = tpu.matmul %0, %1, %cst {dimension_numbers = #tpu.dot_dimension_numbers<[1], [0], [0], [1], [0, 0, 1, 1], [], []>} : vector<16x128xf32>, vector<128x128xf32>, vector<16x128xf32> -> vector<16x128xf32>
    %c0_3 = arith.constant 0 : index
    %c0_4 = arith.constant 0 : index
    %3 = vector.load %arg4[%c0_3, %c0_4] : memref<1x128xf32, #tpu.memory_space<vmem>>, vector<1x128xf32>
    %4 = vector.broadcast %3 : vector<1x128xf32> to vector<16x128xf32>
    %5 = arith.addf %2, %4 : vector<16x128xf32>
    %cst_5 = arith.constant 0.000000e+00 : f32
    %6 = vector.broadcast %cst_5 : f32 to vector<16x128xf32>
    %7 = arith.maximumf %5, %6 : vector<16x128xf32>
    %c0_6 = arith.constant 0 : index
    %c0_7 = arith.constant 0 : index
    %8 = vector.load %arg5[%c0_6, %c0_7] : memref<128x128xf32, #tpu.memory_space<vmem>>, vector<128x128xf32>
    %cst_8 = arith.constant dense<0.000000e+00> : vector<16x128xf32>
    %9 = tpu.matmul %7, %8, %cst_8 {dimension_numbers = #tpu.dot_dimension_numbers<[1], [0], [0], [1], [0, 0, 1, 1], [], []>} : vector<16x128xf32>, vector<128x128xf32>, vector<16x128xf32> -> vector<16x128xf32>
    %c0_9 = arith.constant 0 : index
    %c0_10 = arith.constant 0 : index
    %10 = vector.load %arg6[%c0_9, %c0_10] : memref<1x128xf32, #tpu.memory_space<vmem>>, vector<1x128xf32>
    %11 = vector.broadcast %10 : vector<1x128xf32> to vector<16x128xf32>
    %12 = arith.addf %9, %11 : vector<16x128xf32>
    %cst_11 = arith.constant 0.000000e+00 : f32
    %13 = vector.broadcast %cst_11 : f32 to vector<16x128xf32>
    %14 = arith.maximumf %12, %13 : vector<16x128xf32>
    %c0_12 = arith.constant 0 : index
    %c0_13 = arith.constant 0 : index
    %15 = vector.load %arg7[%c0_12, %c0_13] : memref<128x128xf32, #tpu.memory_space<vmem>>, vector<128x128xf32>
    %cst_14 = arith.constant dense<0.000000e+00> : vector<16x128xf32>
    %16 = tpu.matmul %14, %15, %cst_14 {dimension_numbers = #tpu.dot_dimension_numbers<[1], [0], [0], [1], [0, 0, 1, 1], [], []>} : vector<16x128xf32>, vector<128x128xf32>, vector<16x128xf32> -> vector<16x128xf32>
    %c0_15 = arith.constant 0 : index
    %c0_16 = arith.constant 0 : index
    %17 = vector.load %arg8[%c0_15, %c0_16] : memref<1x128xf32, #tpu.memory_space<vmem>>, vector<1x128xf32>
    %18 = vector.broadcast %17 : vector<1x128xf32> to vector<16x128xf32>
    %19 = arith.addf %16, %18 : vector<16x128xf32>
    %cst_17 = arith.constant dense<0xFF800000> : vector<16xf32>
    %20 = vector.multi_reduction <maximumf>, %19, %cst_17 [1] : vector<16x128xf32> to vector<16xf32>
    %21 = vector.shape_cast %20 : vector<16xf32> to vector<16x1xf32>
    %22 = vector.broadcast %21 : vector<16x1xf32> to vector<16x128xf32>
    %23 = arith.subf %19, %22 : vector<16x128xf32>
    %24 = math.exp %23 : vector<16x128xf32>
    %cst_18 = arith.constant dense<0.000000e+00> : vector<16xf32>
    %25 = vector.multi_reduction <add>, %24, %cst_18 [1] : vector<16x128xf32> to vector<16xf32>
    %26 = vector.shape_cast %25 : vector<16xf32> to vector<16x1xf32>
    %27 = math.log %26 : vector<16x1xf32>
    %28 = vector.broadcast %27 : vector<16x1xf32> to vector<16x128xf32>
    %29 = arith.subf %23, %28 : vector<16x128xf32>
    %c0_19 = arith.constant 0 : index
    %c0_20 = arith.constant 0 : index
    %30 = vector.load %arg10[%c0_19, %c0_20] : memref<16x128xf32, #tpu.memory_space<vmem>>, vector<16x128xf32>
    tpu.vector_store %arg10[%c0_19, %c0_20], %29 {strides = array<i32>} : memref<16x128xf32, #tpu.memory_space<vmem>>, vector<16x128xf32>,
    %31 = vector.broadcast %26 : vector<16x1xf32> to vector<16x128xf32>
    %32 = arith.divf %24, %31 : vector<16x128xf32>
    %c0_21 = arith.constant 0 : index
    %c0_22 = arith.constant 0 : index
    %33 = vector.load %arg11[%c0_21, %c0_22] : memref<16x128xf32, #tpu.memory_space<vmem>>, vector<16x128xf32>
    tpu.vector_store %arg11[%c0_21, %c0_22], %32 {strides = array<i32>} : memref<16x128xf32, #tpu.memory_space<vmem>>, vector<16x128xf32>,
    %c0_23 = arith.constant 0 : index
    %c0_24 = arith.constant 0 : index
    %34 = vector.load %arg2[%c0_23, %c0_24] : memref<16x128xf32, #tpu.memory_space<vmem>>, vector<16x128xf32>
    %35 = arith.addf %19, %34 : vector<16x128xf32>
    %36 = tpu.iota {dimensions = array<i32: 1>} : vector<16x128xi32>
    %cst_25 = arith.constant dense<0xFF800000> : vector<16xf32>
    %37 = vector.multi_reduction <maximumf>, %35, %cst_25 [1] : vector<16x128xf32> to vector<16xf32>
    %38 = vector.shape_cast %37 : vector<16xf32> to vector<16x1xf32>
    %39 = vector.broadcast %38 : vector<16x1xf32> to vector<16x128xf32>
    %40 = arith.cmpf oeq, %35, %39 : vector<16x128xf32>
    %c128_i32 = arith.constant 128 : i32
    %41 = vector.broadcast %c128_i32 : i32 to vector<16x128xi32>
    %42 = arith.select %40, %36, %41 : vector<16x128xi1>, vector<16x128xi32>
    %cst_26 = arith.constant dense<2147483647> : vector<16xi32>
    %43 = vector.multi_reduction <minsi>, %42, %cst_26 [1] : vector<16x128xi32> to vector<16xi32>
    %44 = vector.shape_cast %43 : vector<16xi32> to vector<16x1xi32>
    %45 = vector.shape_cast %44 : vector<16x1xi32> to vector<16x1xi32>
    %46 = vector.broadcast %45 : vector<16x1xi32> to vector<16x128xi32>
    %c0_27 = arith.constant 0 : index
    %c0_28 = arith.constant 0 : index
    %47 = vector.load %arg9[%c0_27, %c0_28] : memref<16x128xi32, #tpu.memory_space<vmem>>, vector<16x128xi32>
    tpu.vector_store %arg9[%c0_27, %c0_28], %46 {strides = array<i32>} : memref<16x128xi32, #tpu.memory_space<vmem>>, vector<16x128xi32>,
    return
  }
  func.func @transform_0(%arg0: i32) -> (i32, i32) {
    %c0_i32 = arith.constant 0 : i32
    %c0_i32_0 = arith.constant 0 : i32
    return %arg0, %c0_i32 : i32, i32
  }
  func.func @transform_1(%arg0: i32) -> (i32, i32) {
    %c0_i32 = arith.constant 0 : i32
    %c0_i32_0 = arith.constant 0 : i32
    return %arg0, %c0_i32 : i32, i32
  }
  func.func @transform_2(%arg0: i32) -> (i32, i32) {
    %c0_i32 = arith.constant 0 : i32
    %c0_i32_0 = arith.constant 0 : i32
    %c0_i32_1 = arith.constant 0 : i32
    return %c0_i32, %c0_i32_0 : i32, i32
  }
  func.func @transform_3(%arg0: i32) -> (i32, i32) {
    %c0_i32 = arith.constant 0 : i32
    %c0_i32_0 = arith.constant 0 : i32
    %c0_i32_1 = arith.constant 0 : i32
    return %c0_i32, %c0_i32_0 : i32, i32
  }
  func.func @transform_4(%arg0: i32) -> (i32, i32) {
    %c0_i32 = arith.constant 0 : i32
    %c0_i32_0 = arith.constant 0 : i32
    %c0_i32_1 = arith.constant 0 : i32
    return %c0_i32, %c0_i32_0 : i32, i32
  }
  func.func @transform_5(%arg0: i32) -> (i32, i32) {
    %c0_i32 = arith.constant 0 : i32
    %c0_i32_0 = arith.constant 0 : i32
    %c0_i32_1 = arith.constant 0 : i32
    return %c0_i32, %c0_i32_0 : i32, i32
  }
  func.func @transform_6(%arg0: i32) -> (i32, i32) {
    %c0_i32 = arith.constant 0 : i32
    %c0_i32_0 = arith.constant 0 : i32
    %c0_i32_1 = arith.constant 0 : i32
    return %c0_i32, %c0_i32_0 : i32, i32
  }
  func.func @transform_7(%arg0: i32) -> (i32, i32) {
    %c0_i32 = arith.constant 0 : i32
    %c0_i32_0 = arith.constant 0 : i32
    %c0_i32_1 = arith.constant 0 : i32
    return %c0_i32, %c0_i32_0 : i32, i32
  }
  func.func @transform_8(%arg0: i32) -> (i32, i32) {
    %c0_i32 = arith.constant 0 : i32
    %c0_i32_0 = arith.constant 0 : i32
    return %arg0, %c0_i32 : i32, i32
  }
  func.func @transform_9(%arg0: i32) -> (i32, i32) {
    %c0_i32 = arith.constant 0 : i32
    %c0_i32_0 = arith.constant 0 : i32
    return %arg0, %c0_i32 : i32, i32
  }
  func.func @transform_10(%arg0: i32) -> (i32, i32) {
    %c0_i32 = arith.constant 0 : i32
    %c0_i32_0 = arith.constant 0 : i32
    return %arg0, %c0_i32 : i32, i32
  }
}

</mosaic_0001>

<bundles_post_ra>
// kernel: tpu_custom_call.1
= control target key start
LH: loop header
LB: loop body
LE: loop exit
PB: predicated region body
PF: predicated region fallthrough
CT: control target
= control target key end

     0   :  { %s2285_s0 = inlined_call_operand.hbm [shape: f32[64,128], index: 0, kind: input, shape index: {}]   ;;  %s2286_s1 = inlined_call_operand.hbm [shape: f32[64,128], index: 1, kind: input, shape index: {}]   ;;  %s2287_s2 = inlined_call_operand.hbm [shape: f32[128,128], index: 2, kind: input, shape index: {}]   ;;  %s2288_s3 = inlined_call_operand.vmem [shape: f32[1,128], index: 3, kind: input, shape index: {}]   ;;  %s2289_s4 = inlined_call_operand.hbm [shape: f32[128,128], index: 4, kind: input, shape index: {}]   ;;  %s2290_s5 = inlined_call_operand.vmem [shape: f32[1,128], index: 5, kind: input, shape index: {}]   ;;  %s2291_s6 = inlined_call_operand.hbm [shape: f32[128,128], index: 6, kind: input, shape index: {}]   ;;  %s2292_s7 = inlined_call_operand.vmem [shape: f32[1,128], index: 7, kind: input, shape index: {}]   ;;  %s2293_s8 = inlined_call_operand.hbm [shape: s32[64,128], index: 8, kind: output, shape index: {0}]   ;;  %s2294_s9 = inlined_call_operand.hbm [shape: f32[64,128], index: 9, kind: output, shape index: {1}]   ;;  %s2295_s10 = inlined_call_operand.hbm [shape: f32[64,128], index: 10, kind: output, shape index: {2}]  }
   0x1   :  { %2308 = sst [smem:[#allocation24_spill]] %s2285_s0 }
   0x2   :  { %2309 = sst [smem:[#allocation25_spill]] %s2287_s2 }
   0x3   :  { %2310 = sst [smem:[#allocation26_spill]] %s2289_s4 }
   0x4   :  { %2311 = sst [smem:[#allocation27_spill]] %s2291_s6 }
   0x5   :  { %2312 = sst [smem:[#allocation28_spill]] %s2293_s8 }
   0x6   :  { %2313 = sst [smem:[#allocation29_spill]] %s2295_s10 }
   0x7   :  { %16 = vsyncpa [#allocation3], 0 }
   0x8   :  { %18 = vsyncpa [#allocation3 + $0x1], 0 }
   0x9   :  { %19 = vsyncpa [#allocation6], 0 }
   0xa   :  { %21 = vsyncpa [#allocation6 + $0x1], 0 }
   0xb   :  { %22 = vsyncpa [#allocation9], 0 }
   0xc   :  { %23 = vsyncpa [#allocation4], 0 }
   0xd   :  { %25 = vsyncpa [#allocation4 + $0x1], 0 }
   0xe   :  { %26 = vsyncpa [#allocation13], 0 }
   0xf   :  { %28 = vsyncpa [#allocation13 + $0x1], 0  ;;  %s1851_s13 = smov 0   ;;  %s1853_s14 = smov 0  }
  0x10   :  { %s1855_s15 = smov 0   ;;  %s1857_s16 = smov 0  }
  0x11 LB: > { %2314 = sst [smem:[#allocation21_spill]] %s1770_s13  ;;  %s1872_s17 = sadd.s32 4294967295, %s1782_s16   ;;  %s1782_s16 = sphi %s1857_s16, %s2347_s16   ;;  %s1778_s15 = sphi %s1855_s15, %s2346_s15   ;;  %s1774_s14 = sphi %s1853_s14, %s2345_s14   ;;  %s1770_s13 = sphi %s1851_s13, %s2344_s13  }
  0x12   : > { %s2296_s18 = sadd.s32 4294967294, %s1782_s16   ;;  %p54_p0 = scmp.ne.s32.totalorder %s1774_s14, %s1770_s13 }
  0x13   : > { %p2297_p1 = scmp.eq.s32.totalorder %s1872_s17, 0  ;;  %p236_p3 = scmp.eq.s32.totalorder %s2296_s18, 3 }
  0x14   : > { %p1098_p5 = scmp.ge.s32.totalorder %s1782_s16, 1  ;;  %p295_p7 = scmp.lt.s32.totalorder %s1782_s16, 5 }
  0x15   : > { %p1883_p4 = por %p2297_p1, %p54_p0  ;;  %p1888_p6 = por %p236_p3, %p54_p0 }
  0x16   : > { %p1893_p8 = pnand %p1098_p5, %p295_p7  ;;  %s1784_s22 = smov [#allocation7]  }
  0x17   : > { %s2315_s19 = scalar_select %p1883_p4, 1, 0 }
  0x18   : > { %s2316_s20 = scalar_select %p1888_p6, 1, 0 }
  0x19   : > { %s2318_s21 = scalar_select %p1893_p8, 1, 0 }
  0x1a   : > { %2317 = sst [smem:[#allocation22_spill]] %s2316_s20  ;;  %s307_s23 = sshll.u32 %s1784_s22, 4  ;;  %s1897_s23 = int_to_ptr.vmem [resolvable:$true] %s307_s23 }
  0x1b   : > { %p1414_p9 = pneg %p1893_p8  ;;  %s1785_s25 = smov [#allocation8]  }
  0x1c   : > { %s323_s26 = sshll.u32 %s1785_s25, 4  ;;  %s1786_s27 = smov [#allocation10]   ;;  %s1907_s26 = int_to_ptr.vmem [resolvable:$true] %s323_s26 }
  0x1d   : > { %p1903_p10 = pnand %p1414_p9, %p2297_p1  ;;  %s1909_s28 = sshll.u32 %s1786_s27, 4  ;;  %s340_s28 = int_to_ptr.vmem [resolvable:$true] %s1909_s28 }
  0x1e   : > { %s2320_s2 = sld [smem:[#allocation25_spill]] }
  0x1f   : > { %p1919_p12 = pneg %p1903_p10 }
  0x24   : > { %s1500_s11 = scalar_lea.hbm %s2320_s2, 2048 }
  0x25   : > { %p1501_p11 = scmp.ne.s32.totalorder %s2320_s2, %s1500_s11  ;;  %p1507_p3 = scmp.lt.u32.totalorder %s1500_s11, %s2320_s2 }
  0x27   : > { %p1503_p13 = pnand %p1919_p12, %p1501_p11 }
  0x29   : > { %p1504_p0 = pneg %p1503_p13 }
  0x2b   : > { %p1509_p5 = pnand %p1507_p3, %p1504_p0 }
  0x2d   : > { %1512 = shalt.err (!%p1509_p5)
}
  0x2e   : > { %s1513_s29 = scalar_lea.vmem %s1897_s23, 2048  ;;  %p1521_p2 = scmp.lt.s32.totalorder %s1897_s23, %s1897_s23 }
  0x2f   : > { %p1514_p7 = scmp.ne.s32.totalorder %s1897_s23, %s1513_s29  ;;  %p1522_p6 = scmp.lt.s32.totalorder %s1513_s29, %s1513_s29 }
  0x31   : > { %p1516_p9 = pnand %p1514_p7, %p1919_p12  ;;  %p1523_p11 = por %p1522_p6, %p1521_p2 }
  0x33   : > { %p1517_p1 = pneg %p1516_p9 }
  0x35   : > { %p1524_p13 = pnand %p1523_p11, %p1517_p1 }
  0x37   : > { %1527 = shalt.err (!%p1524_p13)
}
  0x38   : > { %s2304_s30 = smov 128   ;;  %s2306_s11 = smov 8  }
  0x39   : > { %1417 = dma.hbm_to_vmem [thread:$0]  (!%p1903_p10), %s2320_s2, 2048, %s1897_s23, [#allocation6], %s2304_s30, %s2304_s30, %s2306_s11  }
  0x3a   : > { %s2322_s4 = sld [smem:[#allocation26_spill]] }
  0x40   : > { %s1528_s29 = scalar_lea.hbm %s2322_s4, 2048 }
  0x41   : > { %p1529_p1 = scmp.ne.s32.totalorder %s2322_s4, %s1528_s29  ;;  %p1535_p0 = scmp.lt.u32.totalorder %s1528_s29, %s2322_s4 }
  0x43   : > { %p1531_p2 = pnand %p1529_p1, %p1919_p12 }
  0x45   : > { %p1532_p6 = pneg %p1531_p2 }
  0x47   : > { %p1537_p3 = pnand %p1535_p0, %p1532_p6 }
  0x49   : > { %1540 = shalt.err (!%p1537_p3)
}
  0x4a   : > { %s1541_s23 = scalar_lea.vmem %s1907_s26, 2048  ;;  %p1549_p11 = scmp.lt.s32.totalorder %s1907_s26, %s1907_s26 }
  0x4b   : > { %p1542_p5 = scmp.ne.s32.totalorder %s1907_s26, %s1541_s23  ;;  %p1550_p13 = scmp.lt.s32.totalorder %s1541_s23, %s1541_s23 }
  0x4d   : > { %p1544_p7 = pnand %p1542_p5, %p1919_p12  ;;  %p1551_p1 = por %p1550_p13, %p1549_p11 }
  0x4f   : > { %p1545_p9 = pneg %p1544_p7 }
  0x51   : > { %p1552_p2 = pnand %p1551_p1, %p1545_p9 }
  0x53   : > { %1555 = shalt.err (!%p1552_p2)
}
  0x54   : > { %1420 = dma.hbm_to_vmem [thread:$0]  (!%p1903_p10), %s2322_s4, 2048, %s1907_s26, [#allocation9], %s2304_s30, %s2304_s30, %s2306_s11  }
  0x55   : > { %s2323_s6 = sld [smem:[#allocation27_spill]] }
  0x5b   : > { %s1556_s12 = scalar_lea.hbm %s2323_s6, 2048 }
  0x5c   : > { %p1557_p6 = scmp.ne.s32.totalorder %s2323_s6, %s1556_s12  ;;  %p1563_p5 = scmp.lt.u32.totalorder %s1556_s12, %s2323_s6 }
  0x5e   : > { %p1559_p0 = pnand %p1557_p6, %p1919_p12 }
  0x60   : > { %p1560_p3 = pneg %p1559_p0 }
  0x62   : > { %p1565_p7 = pnand %p1563_p5, %p1560_p3 }
  0x64   : > { %1568 = shalt.err (!%p1565_p7)
}
  0x65   : > { %s1569_s23 = scalar_lea.vmem %s340_s28, 2048  ;;  %p1577_p1 = scmp.lt.s32.totalorder %s340_s28, %s340_s28 }
  0x66   : > { %p1570_p9 = scmp.ne.s32.totalorder %s340_s28, %s1569_s23  ;;  %p1578_p2 = scmp.lt.s32.totalorder %s1569_s23, %s1569_s23 }
  0x68   : > { %p1572_p11 = pnand %p1570_p9, %p1919_p12  ;;  %p1579_p4 = por %p1578_p2, %p1577_p1 }
  0x6a   : > { %p1573_p13 = pneg %p1572_p11 }
  0x6c   : > { %p1580_p8 = pnand %p1579_p4, %p1573_p13 }
  0x6e   : > { %1583 = shalt.err (!%p1580_p8)
}
  0x6f   : > { %1423 = dma.hbm_to_vmem [thread:$0]  (!%p1903_p10), %s2323_s6, 2048, %s340_s28, [#allocation9], %s2304_s30, %s2304_s30, %s2306_s11  }
  0x70   : > { %s1992_s18 = sadd.s32 1, %s1782_s16   ;;  %s41_s10 = sadd.s32 1, %s1778_s15 }
  0x71   : > { %s38_s24 = ssub.s32 %s1782_s16, %s1992_s18  ;;  %p48_p8 = scmp.ne.s32.totalorder %s1778_s15, %s1774_s14 }
  0x72   : > { %p39_p4 = scmp.eq.s32.totalorder %s38_s24, 0  ;;  %p49_p12 = scmp.eq.s32.totalorder %s1782_s16, 0 }
  0x73   : > { %p1444_p6 = scmp.lt.s32.totalorder %s1782_s16, 4  ;;  %p2325_p3 = scmp.eq.s32.totalorder %s1872_s17, 3 }
  0x74   : > { %s2002_s13 = scalar_select %p39_p4, %s1778_s15, %s41_s10  }
  0x75   : > { %p50_p0 = por %p49_p12, %p48_p8  ;;  %p2006_p5 = por %p2325_p3, %p48_p8 }
  0x76   : > { %2324 = sst [smem:[#allocation23_spill]] %s2002_s13  ;;  %s356_s12 = sand.u32 1, %s1778_s15  }
  0x77   : > { %s1132_s22 = sshll.u32 %s1782_s16, 8  ;;  %s2012_s28 = sshll.u32 %s356_s12, 4 }
  0x78   : > { %s2327_s0 = sld [smem:[#allocation24_spill]]  ;;  %s360_s23 = scalar_lea.vmem [#allocation2], %s2012_s28 }
  0x79   : > { %s367_s26 = sshll.u32 %s360_s23, 4  ;;  %p2020_p10 = pnand %p1444_p6, %p50_p0  ;;  %s2024_s26 = int_to_ptr.vmem [resolvable:$true] %s367_s26 }
  0x7a   : > { %s2029_s25 = scalar_lea.hbm %s2286_s1, %s1132_s22  ;;  %s2031_s27 = scalar_lea.sflag [#allocation3], %s356_s12 }
  0x7b   : > { %p1586_p9 = pneg %p2020_p10 }
  0x7e   : > { %s2017_s29 = scalar_lea.hbm %s2327_s0, %s1132_s22  ;;  %s1589_s2 = scalar_lea.hbm %s2327_s0, 1024 }
  0x7f   : > { %s1584_s30 = scalar_lea.hbm %s2017_s29, 256  ;;  %p1590_p1 = scmp.lt.u32.totalorder %s2017_s29, %s2327_s0 }
  0x80   : > { %p1585_p7 = scmp.ne.s32.totalorder %s2017_s29, %s1584_s30  ;;  %p1591_p2 = scmp.lt.u32.totalorder %s1589_s2, %s1584_s30 }
  0x81   : > { %p1593_p8 = scmp.lt.u32.totalorder %s1584_s30, %s2017_s29 }
  0x82   : > { %p1587_p11 = pnand %p1586_p9, %p1585_p7  ;;  %p1592_p4 = por %p1591_p2, %p1590_p1 }
  0x84   : > { %p1588_p13 = pneg %p1587_p11  ;;  %p1594_p12 = por %p1593_p8, %p1592_p4 }
  0x86   : > { %p1595_p6 = pnand %p1594_p12, %p1588_p13 }
  0x88   : > { %1598 = shalt.err (!%p1595_p6)
}
  0x89   : > { %s1599_s12 = scalar_lea.vmem %s2024_s26, 256  ;;  %s1789_s11 = smov [#allocation2]  }
  0x8a   : > { %p1600_p0 = scmp.ne.s32.totalorder %s2024_s26, %s1599_s12  ;;  %s1604_s22 = sshll.u32 %s1789_s11, 4  ;;  %s1605_s22 = int_to_ptr.vmem [resolvable:$false] %s1604_s22 }
  0x8b   : > { %s1606_s4 = scalar_lea.vmem %s1605_s22, 512  ;;  %p1607_p11 = scmp.lt.s32.totalorder %s2024_s26, %s1605_s22 }
  0x8c   : > { %p1602_p3 = pnand %p1600_p0, %p1586_p9  ;;  %p1608_p1 = scmp.lt.s32.totalorder %s1606_s4, %s1599_s12 }
  0x8e   : > { %p1603_p7 = pneg %p1602_p3  ;;  %p1609_p2 = por %p1608_p1, %p1607_p11 }
  0x90   : > { %p1610_p4 = pnand %p1609_p2, %p1603_p7 }
  0x92   : > { %1613 = shalt.err (!%p1610_p4)
}
  0x93   : > { %s2329_s2 = smov 8   ;;  %s2330_s6 = smov 128  }
  0x94   : > { %1427 = dma.hbm_to_vmem [thread:$0]  (!%p2020_p10), %s2017_s29, 256, %s2024_s26, %s2031_s27, %s2330_s6, %s2330_s6, %s2329_s2  }
  0x95   : > { %s381_s30 = scalar_lea.vmem [#allocation5], %s2012_s28  ;;  %s377_s10 = sand.u32 1, %s1782_s16  }
  0x96   : > { %s388_s24 = sshll.u32 %s381_s30, 4  ;;  %s2066_s23 = scalar_lea.sflag [#allocation6], %s377_s10  ;;  %s2064_s24 = int_to_ptr.vmem [resolvable:$true] %s388_s24 }
  0x97   : > { %s1614_s12 = scalar_lea.hbm %s2029_s25, 256  ;;  %s1619_s4 = scalar_lea.hbm %s2286_s1, 1024 }
  0x98   : > { %p1615_p13 = scmp.ne.s32.totalorder %s2029_s25, %s1614_s12  ;;  %p1620_p6 = scmp.lt.u32.totalorder %s2029_s25, %s2286_s1 }
  0x99   : > { %p1621_p0 = scmp.lt.u32.totalorder %s1619_s4, %s1614_s12  ;;  %p1623_p7 = scmp.lt.u32.totalorder %s1614_s12, %s2029_s25 }
  0x9a   : > { %p1617_p8 = pnand %p1615_p13, %p1586_p9 }
  0x9b   : > { %p1622_p3 = por %p1621_p0, %p1620_p6 }
  0x9c   : > { %p1618_p12 = pneg %p1617_p8 }
  0x9d   : > { %p1624_p11 = por %p1623_p7, %p1622_p3 }
  0x9f   : > { %p1625_p1 = pnand %p1624_p11, %p1618_p12 }
  0xa1   : > { %1628 = shalt.err (!%p1625_p1)
}
  0xa2   : > { %s1629_s28 = scalar_lea.vmem %s2064_s24, 256  ;;  %s1790_s29 = smov [#allocation5]  }
  0xa3   : > { %p1630_p2 = scmp.ne.s32.totalorder %s2064_s24, %s1629_s28  ;;  %s1634_s26 = sshll.u32 %s1790_s29, 4  ;;  %s1635_s26 = int_to_ptr.vmem [resolvable:$false] %s1634_s26 }
  0xa4   : > { %s1636_s0 = scalar_lea.vmem %s1635_s26, 512  ;;  %p1637_p8 = scmp.lt.s32.totalorder %s2064_s24, %s1635_s26 }
  0xa5   : > { %p1632_p4 = pnand %p1630_p2, %p1586_p9  ;;  %p1638_p6 = scmp.lt.s32.totalorder %s1636_s0, %s1629_s28 }
  0xa7   : > { %p1633_p13 = pneg %p1632_p4  ;;  %p1639_p0 = por %p1638_p6, %p1637_p8 }
  0xa9   : > { %p1640_p3 = pnand %p1639_p0, %p1633_p13 }
  0xab   : > { %1643 = shalt.err (!%p1640_p3)
}
  0xac   : > { %1430 = dma.hbm_to_vmem [thread:$0]  (!%p2020_p10), %s2029_s25, 256, %s2064_s24, %s2066_s23, %s2330_s6, %s2330_s6, %s2329_s2  }
  0xad   : > { %p2331_p9 = scmp.ne.s32.totalorder %s2318_s21, 0 }
  0xae   : > { %s2098_s13 = sand.u32 (!%p2331_p9), 1, %s1774_s14   ;;  %p2332_p12 = scmp.ne.s32.totalorder (!%p2331_p9), %s2315_s19, 0 }
  0xaf   : > { %400 = sbr.rel (%p2331_p9) target bundleno = 1337 (0x539), region = 52  ;;  %s2101_s27 = sshll.u32 (!%p2331_p9), %s2098_s13, 4 }
  0xb0   : > { %s403_s8 = scalar_lea.sflag (!%p2331_p9), [#allocation3], %s2098_s13  ;;  %s406_s30 = scalar_lea.vmem (!%p2331_p9), [#allocation2], %s2101_s27 }
  0xb6   : > { %1745 = dma.done.wait (%p2332_p12), %s403_s8, 256  }
  0xb7   : > { %1747 = vsyncadd (%p2332_p12), %s403_s8, 4294967040  ;;  %s411_s21 = sand.u32 1, %s1872_s17   ;;  %s415_s2 = scalar_lea.vmem [#allocation5], %s2101_s27 }
  0xb8   : > { %s412_s25 = scalar_lea.sflag [#allocation6], %s411_s21 }
  0xb9   : > { %1749 = dma.done.wait (%p2332_p12), %s412_s25, 256  }
  0xba   : > { %1751 = vsyncadd (%p2332_p12), %s412_s25, 4294967040  ;;  %p2333_p10 = scmp.eq.s32.totalorder %s1872_s17, 0 }
  0xbc   : > { %1753 = dma.done.wait (%p2333_p10), [#allocation6], 2048   ;;  %p2334_p7 = pmov %p2333_p10 }
  0xbe   : > { %1755 = vsyncadd (%p2334_p7), [#allocation6], 4294965248  ;;  %p2335_p11 = pmov %p2334_p7 }
  0xbf   : > { %p2336_p1 = pmov %p2334_p7 }
  0xc0   : > { %1757 = dma.done.wait (%p2335_p11), [#allocation9], 4096  }
  0xc1   : > { %1759 = vsyncadd (%p2336_p1), [#allocation9], 4294963200  ;;  %v486_v0 = vld [vmem:[#allocation7] sm:$0xff]  ;;  %v487_v1 = vld [vmem:[#allocation7 + $0x8] sm:$0xff]  ;;  %s2149_s11 = scalar_lea.vmem [#allocation14], %s2101_s27  ;;  %s471_s22 = scalar_lea.vmem [#allocation12], %s2101_s27 }
  0xc2   : > { %v488_v2 = vld [vmem:[#allocation7 + $0x10] sm:$0xff]  ;;  %v1296_v3 = vpack.c.bf16 %v487_v1, %v486_v0  ;;  %v489_v4 = vld [vmem:[#allocation7 + $0x18] sm:$0xff]  ;;  %v490_v6 = vld [vmem:[#allocation7 + $0x20] sm:$0xff]  ;;  %s896_s4 = sshll.u32 %s471_s22, 4  ;;  %s2154_s28 = sshll.u32 %s1872_s17, 8  ;;  %s2163_s4 = int_to_ptr.vmem [resolvable:$true] %s896_s4 }
  0xc3   : > { %v1300_v5 = vpack.c.bf16 %v489_v4, %v488_v2  ;;  %v491_v7 = vld [vmem:[#allocation7 + $0x28] sm:$0xff]  ;;  %v492_v9 = vld [vmem:[#allocation7 + $0x30] sm:$0xff]  ;;  %v493_v10 = vld [vmem:[#allocation7 + $0x38] sm:$0xff]  ;;  %s2161_s0 = scalar_lea.hbm %s2294_s9, %s2154_s28  ;;  %s2167_s8 = scalar_lea.sflag [#allocation13], %s411_s21 }
  0xc4   : > { %1297 = vmatprep.subr.bf16.mxu0 %v1296_v3  ;;  %v1304_v8 = vpack.c.bf16 %v491_v7, %v490_v6  ;;  %v484_v11 = vld [vmem:[%s406_s30] sm:$0xff]  ;;  %v587_v13 = vld [vmem:[#allocation8 + $0x8] sm:$0xff]  ;;  %v589_v16 = vld [vmem:[#allocation8 + $0x18] sm:$0xff]  ;;  %v1308_v20 = vpack.c.bf16 %v493_v10, %v492_v9  ;;  %s1791_s25 = smov [#allocation12]  }
  0xc5   : > { %1299 = vmatpush3.bf16.msra.mxu0 %v1296_v3  ;;  %1223 = vmatprep.mubr.f32.mxu0 %v484_v11  ;;  %v586_v12 = vld [vmem:[#allocation8] sm:$0xff]  ;;  %v588_v14 = vld [vmem:[#allocation8 + $0x10] sm:$0xff]  ;;  %v591_v19 = vld [vmem:[#allocation8 + $0x28] sm:$0xff] }
  0xc6   : > { %1301 = vmatprep.subr.bf16.mxu0 %v1300_v5  ;;  %v1328_v15 = vpack.c.bf16 %v587_v13, %v586_v12  ;;  %v1332_v17 = vpack.c.bf16 %v589_v16, %v588_v14  ;;  %v590_v18 = vld [vmem:[#allocation8 + $0x20] sm:$0xff]  ;;  %v495_v22 = vld [vmem:[#allocation7 + $0x48] sm:$0xff]  ;;  %v592_v24 = vld [vmem:[#allocation8 + $0x30] sm:$0xff] }
  0xc7   : > { %v494_v21 = vld [vmem:[#allocation7 + $0x40] sm:$0xff]  ;;  %v1336_v23 = vpack.c.bf16 %v591_v19, %v590_v18  ;;  %v593_v25 = vld [vmem:[#allocation8 + $0x38] sm:$0xff]  ;;  %v496_v27 = vld [vmem:[#allocation7 + $0x50] sm:$0xff] }
  0xc8   : > { %1329 = vmatprep.subr.bf16.mxu1 %v1328_v15  ;;  %v1312_v26 = vpack.c.bf16 %v495_v22, %v494_v21  ;;  %v497_v28 = vld [vmem:[#allocation7 + $0x58] sm:$0xff]  ;;  %v1340_v29 = vpack.c.bf16 %v593_v25, %v592_v24  ;;  %v594_v30 = vld [vmem:[#allocation8 + $0x40] sm:$0xff]  ;;  %v595_v31 = vld [vmem:[#allocation8 + $0x48] sm:$0xff] }
  0xc9   : > { %1303 = vmatpush3.bf16.msra.mxu0 %v1300_v5  ;;  %1331 = vmatpush3.bf16.msra.mxu1 %v1328_v15  ;;  %v1316_v32 = vpack.c.bf16 %v497_v28, %v496_v27  ;;  %v498_v33 = vld [vmem:[#allocation7 + $0x60] sm:$0xff]  ;;  %v499_v34 = vld [vmem:[#allocation7 + $0x68] sm:$0xff]  ;;  %v1344_v35 = vpack.c.bf16 %v595_v31, %v594_v30  ;;  %v596_v36 = vld [vmem:[#allocation8 + $0x50] sm:$0xff] }
  0xca   : > { %1305 = vmatprep.subr.bf16.mxu0 %v1304_v8  ;;  %1333 = vmatprep.subr.bf16.mxu1 %v1332_v17  ;;  %v597_v37 = vld [vmem:[#allocation8 + $0x58] sm:$0xff]  ;;  %v1320_v38 = vpack.c.bf16 %v499_v34, %v498_v33  ;;  %v500_v39 = vld [vmem:[#allocation7 + $0x70] sm:$0xff]  ;;  %v598_v42 = vld [vmem:[#allocation8 + $0x60] sm:$0xff]  ;;  %v816_v33 = vlaneseq }
  0xcb   : > { %v501_v40 = vld [vmem:[#allocation7 + $0x78] sm:$0xff]  ;;  %v1348_v41 = vpack.c.bf16 %v597_v37, %v596_v36  ;;  %v599_v43 = vld [vmem:[#allocation8 + $0x68] sm:$0xff]  ;;  %v600_v47 = vld [vmem:[#allocation8 + $0x70] sm:$0xff] }
  0xcc   : > { %v1324_v44 = vpack.c.bf16 %v501_v40, %v500_v39  ;;  %v1352_v45 = vpack.c.bf16 %v599_v43, %v598_v42  ;;  %v485_v46 = vld [vmem:[%s406_s30 + $0x8] sm:$0xff]  ;;  %v686_v50 = vld [vmem:[#allocation10] sm:$0xff]  ;;  %v688_v52 = vld [vmem:[#allocation10 + $0x10] sm:$0xff]  ;;  %s1644_s30 = scalar_lea.vmem %s2163_s4, 256 }
  0xcd   : > { %1307 = vmatpush3.bf16.msra.mxu0 %v1304_v8  ;;  %1335 = vmatpush3.bf16.msra.mxu1 %v1332_v17  ;;  %v601_v48 = vld [vmem:[#allocation8 + $0x78] sm:$0xff]  ;;  %v687_v51 = vld [vmem:[#allocation10 + $0x8] sm:$0xff]  ;;  %v690_v56 = vld [vmem:[#allocation10 + $0x20] sm:$0xff]  ;;  %p1645_p2 = scmp.ne.s32.totalorder %s2163_s4, %s1644_s30 }
  0xce   : > { %1309 = vmatprep.subr.bf16.mxu0 %v1308_v20  ;;  %1337 = vmatprep.subr.bf16.mxu1 %v1336_v23  ;;  %v1356_v49 = vpack.c.bf16 %v601_v48, %v600_v47  ;;  %v1360_v53 = vpack.c.bf16 %v687_v51, %v686_v50  ;;  %v689_v54 = vld [vmem:[#allocation10 + $0x18] sm:$0xff]  ;;  %v691_v57 = vld [vmem:[#allocation10 + $0x28] sm:$0xff]  ;;  %v692_v59 = vld [vmem:[#allocation10 + $0x30] sm:$0xff] }
  0xcf   : > { %v1364_v55 = vpack.c.bf16 %v689_v54, %v688_v52  ;;  %v1368_v58 = vpack.c.bf16 %v691_v57, %v690_v56  ;;  %v693_v60 = vld [vmem:[#allocation10 + $0x38] sm:$0xff]  ;;  %v694_v62 = vld [vmem:[#allocation10 + $0x40] sm:$0xff]  ;;  %v695_v63 = vld [vmem:[#allocation10 + $0x48] sm:$0xff]  ;;  %p1646_p4 = pnand %p1645_p2, %p2006_p5 }
  0xd0   : > { %v1372_v61 = vpack.c.bf16 %v693_v60, %v692_v59  ;;  %v1376_v0 = vpack.c.bf16 %v695_v63, %v694_v62  ;;  %v696_v1 = vld [vmem:[#allocation10 + $0x50] sm:$0xff]  ;;  %v697_v2 = vld [vmem:[#allocation10 + $0x58] sm:$0xff]  ;;  %v698_v4 = vld [vmem:[#allocation10 + $0x60] sm:$0xff] }
  0xd1   : > { %1311 = vmatpush3.bf16.msra.mxu0 %v1308_v20  ;;  %1339 = vmatpush3.bf16.msra.mxu1 %v1336_v23  ;;  %v1380_v3 = vpack.c.bf16 %v697_v2, %v696_v1  ;;  %v699_v5 = vld [vmem:[#allocation10 + $0x68] sm:$0xff]  ;;  %v1118_v7 = vld [vmem:[%s2288_s3] ss:$0 sm:$0xff]  ;;  %v700_v14 = vld [vmem:[#allocation10 + $0x70] sm:$0xff]  ;;  %p1647_p13 = pneg %p1646_p4 }
  0xd2   : > { %1313 = vmatprep.subr.bf16.mxu0 %v1312_v26  ;;  %1341 = vmatprep.subr.bf16.mxu1 %v1340_v29  ;;  %v1384_v6 = vpack.c.bf16 %v699_v5, %v698_v4  ;;  %v701_v15 = vld [vmem:[#allocation10 + $0x78] sm:$0xff]  ;;  %v1119_v17 = vld [vmem:[%s2290_s5] ss:$0 sm:$0xff] }
  0xd3   : > { %v1388_v16 = vpack.c.bf16 %v701_v15, %v700_v14  ;;  %v1120_v24 = vld [vmem:[%s2292_s7] ss:$0 sm:$0xff]  ;;  %v813_v31 = vld [vmem:[%s415_s2 + $0x8] sm:$0xff] }
  0xd4   : > { %v812_v27 = vld [vmem:[%s415_s2] sm:$0xff]  ;;  %s1648_s2 = sshll.u32 %s1791_s25, 4  ;;  %s1649_s2 = int_to_ptr.vmem [resolvable:$false] %s1648_s2 }
  0xd5   : > { %1315 = vmatpush3.bf16.msra.mxu0 %v1312_v26  ;;  %1343 = vmatpush3.bf16.msra.mxu1 %v1340_v29  ;;  %s1650_s19 = scalar_lea.vmem %s1649_s2, 512  ;;  %p1651_p8 = scmp.lt.s32.totalorder %s2163_s4, %s1649_s2 }
  0xd6   : > { %1317 = vmatprep.subr.bf16.mxu0 %v1316_v32  ;;  %1345 = vmatprep.subr.bf16.mxu1 %v1344_v35  ;;  %p1652_p6 = scmp.lt.s32.totalorder %s1650_s19, %s1644_s30 }
  0xd8   : > { %p1653_p0 = por %p1652_p6, %p1651_p8 }
  0xd9   : > { %1319 = vmatpush3.bf16.msra.mxu0 %v1316_v32  ;;  %1347 = vmatpush3.bf16.msra.mxu1 %v1344_v35  ;;  %v817_v35 = vand.u32 127, %v816_v33 }
  0xda   : > { %1321 = vmatprep.subr.bf16.mxu0 %v1320_v38  ;;  %1349 = vmatprep.subr.bf16.mxu1 %v1348_v41  ;;  %p1654_p3 = pnand %p1653_p0, %p1647_p13 }
  0xdd   : > { %1323 = vmatpush3.bf16.msra.mxu0 %v1320_v38  ;;  %1351 = vmatpush3.bf16.msra.mxu1 %v1348_v41 }
  0xde   : > { %1325 = vmatprep.subr.bf16.mxu0 %v1324_v44  ;;  %1353 = vmatprep.subr.bf16.mxu1 %v1352_v45 }
  0xe1   : > { %1327 = vmatpush3.bf16.msra.mxu0 %v1324_v44  ;;  %1355 = vmatpush3.bf16.msra.mxu1 %v1352_v45 }
  0xe2   : > { %1357 = vmatprep.subr.bf16.mxu1 %v1356_v49  ;;  %1361 = vmatprep.subr.bf16.mxu0 %v1360_v53 }
  0xe4   : > { %1224 = vmatmul.mubr.f32.vlgmr.msra.gmra.mrb[0].mxu0 %v485_v46 }
  0xe5   : > { %1359 = vmatpush3.bf16.msra.mxu1 %v1356_v49  ;;  %1363 = vmatpush3.bf16.msra.mxu0 %v1360_v53 }
  0xe6   : > { %1365 = vmatprep.subr.bf16.mxu0 %v1364_v55 }
  0xe9   : > { %1367 = vmatpush3.bf16.msra.mxu0 %v1364_v55 }
  0xea   : > { %1369 = vmatprep.subr.bf16.mxu0 %v1368_v58 }
  0xed   : > { %1371 = vmatpush3.bf16.msra.mxu0 %v1368_v58 }
  0xee   : > { %1373 = vmatprep.subr.bf16.mxu0 %v1372_v61 }
  0xf1   : > { %1375 = vmatpush3.bf16.msra.mxu0 %v1372_v61 }
  0xf2   : > { %1377 = vmatprep.subr.bf16.mxu0 %v1376_v0 }
  0xf5   : > { %1379 = vmatpush3.bf16.msra.mxu0 %v1376_v0 }
  0xf6   : > { %1381 = vmatprep.subr.bf16.mxu0 %v1380_v3 }
  0xf9   : > { %1383 = vmatpush3.bf16.msra.mxu0 %v1380_v3 }
  0xfa   : > { %1385 = vmatprep.subr.bf16.mxu0 %v1384_v6 }
  0xfd   : > { %1387 = vmatpush3.bf16.msra.mxu0 %v1384_v6 }
  0xfe   : > { %1389 = vmatprep.subr.bf16.mxu0 %v1388_v16 }
 0x101   : > { %1391 = vmatpush3.bf16.msra.mxu0 %v1388_v16 }
 0x1b7   : > { %v1225_v8 = vpop.f32.mrb[0].mxu0 }
 0x1b8   : > { %v581_v9 = vadd.f32 %v1225_v8, %v1118_v7  ;;  %v575_v10 = vpop.f32.mrb[1].mxu0 }
 0x1b9   : > { %v576_v11 = vadd.f32 %v1118_v7, %v575_v10 }
 0x1ba   : > { %v585_v13 = vmax.f32 %v581_v9, 0.0 }
 0x1bb   : > { %v584_v12 = vmax.f32 %v576_v11, 0.0 }
 0x1bd   : > { %1258 = vmatprep.mubr.f32.mxu1 %v584_v12 }
 0x1be   : > { %1259 = vmatmul.mubr.f32.vlgmr.msra.gmra.mrb[0].mxu1 %v585_v13 }
 0x291   : > { %v1260_v18 = vpop.f32.mrb[0].mxu1 }
 0x292   : > { %v681_v19 = vadd.f32 %v1260_v18, %v1119_v17  ;;  %v675_v20 = vpop.f32.mrb[1].mxu1 }
 0x293   : > { %v676_v21 = vadd.f32 %v1119_v17, %v675_v20 }
 0x294   : > { %v685_v23 = vmax.f32 %v681_v19, 0.0 }
 0x295   : > { %v684_v22 = vmax.f32 %v676_v21, 0.0 }
 0x297   : > { %1293 = vmatprep.mubr.f32.mxu0 %v684_v22 }
 0x298   : > { %1294 = vmatmul.mubr.f32.vlgmr.msra.gmra.mrb[2].mxu0 %v685_v23 }
 0x36b   : > { %v1295_v25 = vpop.f32.mrb[2].mxu0 }
 0x36c   : > { %v775_v26 = vpop.f32.mrb[3].mxu0  ;;  %v781_v29 = vadd.f32 %v1295_v25, %v1120_v24 }
 0x36d   : > { %v776_v28 = vadd.f32 %v1120_v24, %v775_v26 }
 0x36e   : > { %v815_v32 = vadd.f32 %v813_v31, %v781_v29 }
 0x36f   : > { %784 = vmax.xlane.f32.xlu1 %v776_v28  ;;  %v814_v30 = vadd.f32 %v812_v27, %v776_v28 }
 0x371   : > { %818 = vmax.xlane.f32.xlu0 %v814_v30 }
 0x373   : > { %786 = vmax.xlane.f32.xlu1 %v781_v29 }
 0x375   : > { %820 = vmax.xlane.f32.xlu0 %v815_v32 }
 0x3fc   : > { %v785_v34 = vpop.xlane.xlu1 %784 }
 0x3fd   : > { %v788_v36 = vsub.f32 %v776_v28, %v785_v34 }
 0x3fe   : > { %v819_v37 = vpop.xlane.xlu0 %818 }
 0x3ff   : > { %v790_v38 = vmul.f32 1.442695, %v788_v36  ;;  %vm822_vm0 = vcmp.eq.f32.partialorder %v814_v30, %v819_v37 }
 0x400   : > { %v824_v39 = vsel %vm822_vm0, %v817_v35, 128  ;;  %v787_v40 = vpop.xlane.xlu1 %786 }
 0x401   : > { %1488 = vpow2.f32 %v790_v38  ;;  %v789_v41 = vsub.f32 %v781_v29, %v787_v40  ;;  %v827_v42 = vshra.s32 %v824_v39, 16  ;;  %v826_v51 = vand.u32 65535, %v824_v39 }
 0x402   : > { %v821_v43 = vpop.xlane.xlu0 %820 }
 0x403   : > { %v792_v44 = vmul.f32 1.442695, %v789_v41  ;;  %vm823_vm1 = vcmp.eq.f32.partialorder %v815_v32, %v821_v43  ;;  %v829_v45 = vcvt.s32.f32 %v827_v42  ;;  %v828_v54 = vcvt.s32.f32 %v826_v51 }
 0x404   : > { %v825_v46 = vsel %vm823_vm1, %v817_v35, 128 }
 0x405   : > { %1490 = vpow2.f32 %v792_v44  ;;  %830 = vmin.xlane.f32.xlu0 %v829_v45  ;;  %v841_v47 = vshra.s32 %v825_v46, 16  ;;  %v840_v52 = vand.u32 65535, %v825_v46 }
 0x407   : > { %v843_v48 = vcvt.s32.f32 %v841_v47  ;;  %v842_v57 = vcvt.s32.f32 %v840_v52 }
 0x409   : > { %844 = vmin.xlane.f32.xlu1 %v843_v48 }
 0x40b   : > { %v1489_v49 = vpop.eup %1488 }
 0x40c   : > { %794 = vadd.xlane.f32.xlu0 %v1489_v49 }
 0x40f   : > { %v1491_v50 = vpop.eup %1490 }
 0x410   : > { %796 = vadd.xlane.f32.xlu1 %v1491_v50 }
 0x492   : > { %v2142_v53 = vpop.xlane.xlu0 %830 }
 0x493   : > { %vm832_vm2 = vcmp.eq.f32.partialorder %v829_v45, %v2142_v53 }
 0x494   : > { %v833_v55 = vsel %vm832_vm2, %v828_v54, inf }
 0x495   : > { %834 = vmin.xlane.f32.xlu0 %v833_v55 }
 0x496   : > { %v2145_v56 = vpop.xlane.xlu1 %844 }
 0x497   : > { %vm846_vm3 = vcmp.eq.f32.partialorder %v843_v48, %v2145_v56 }
 0x498   : > { %v847_v58 = vsel %vm846_vm3, %v842_v57, inf }
 0x499   : > { %848 = vmin.xlane.f32.xlu1 %v847_v58  ;;  %v795_v59 = vpop.xlane.xlu0 %794 }
 0x49a   : > { %1492 = vlog2.f32 %v795_v59 }
 0x49b   : > { %1494 = vrcp.f32 %v795_v59 }
 0x49d   : > { %v797_v60 = vpop.xlane.xlu1 %796 }
 0x49e   : > { %1496 = vlog2.f32 %v797_v60 }
 0x49f   : > { %1498 = vrcp.f32 %v797_v60 }
 0x4a4   : > { %v1493_v61 = vpop.eup %1492 }
 0x4a5   : > { %v1495_v62 = vpop.eup %1494  ;;  %v799_v63 = vmul.f32 0.6931472, %v1493_v61 }
 0x4a6   : > { %v807_v0 = vmul.f32 %v1495_v62, %v1489_v49 }
 0x4a7   : > { %v802_v1 = vsub.f32 %v788_v36, %v799_v63 }
 0x4a8   : > { %v1497_v2 = vpop.eup %1496  ;;  %810 = vst [vmem:[%s2149_s11] sm:$0xff] %v807_v0 }
 0x4a9   : > { %v1499_v3 = vpop.eup %1498  ;;  %804 = vst [vmem:[%s471_s22] sm:$0xff] %v802_v1  ;;  %v801_v4 = vmul.f32 0.6931472, %v1497_v2 }
 0x4aa   : > { %v809_v5 = vmul.f32 %v1499_v3, %v1491_v50 }
 0x4ab   : > { %v803_v6 = vsub.f32 %v789_v41, %v801_v4 }
 0x4ac   : > { %811 = vst [vmem:[%s2149_s11 + $0x8] sm:$0xff] %v809_v5 }
 0x4ad   : > { %805 = vst [vmem:[%s471_s22 + $0x8] sm:$0xff] %v803_v6 }
 0x4ae   : > { %1657 = shalt.err (!%p1654_p3)
}
 0x4af   : > { %s1658_s17 = scalar_lea.hbm %s2161_s0, 256  ;;  %s1662_s24 = scalar_lea.hbm %s2294_s9, 1024 }
 0x4b0   : > { %p1659_p9 = scmp.ne.s32.totalorder %s2161_s0, %s1658_s17  ;;  %p1663_p7 = scmp.lt.u32.totalorder %s2161_s0, %s2294_s9 }
 0x4b1   : > { %p1664_p11 = scmp.lt.u32.totalorder %s1662_s24, %s1658_s17  ;;  %p1666_p2 = scmp.lt.u32.totalorder %s1658_s17, %s2161_s0 }
 0x4b2   : > { %p1660_p12 = pnand %p1659_p9, %p2006_p5 }
 0x4b3   : > { %p1665_p1 = por %p1664_p11, %p1663_p7 }
 0x4b4   : > { %p1661_p10 = pneg %p1660_p12 }
 0x4b5   : > { %p1667_p4 = por %p1666_p2, %p1665_p1 }
 0x4b7   : > { %p1668_p13 = pnand %p1667_p4, %p1661_p10 }
 0x4b9   : > { %1671 = shalt.err (!%p1668_p13)
}
 0x4ba   : > { %s1792_s12 = smov 128   ;;  %s1793_s22 = smov 8  }
 0x4bb   : > { %1409 = dma.vmem_to_hbm [thread:$0]  (%p2006_p5), %s2163_s4, 256, %s2161_s0, %s2167_s8, %s1792_s12, %s1792_s12, %s1793_s22  }
 0x4bc   : > { %s2337_s30 = sld [smem:[#allocation29_spill]]  ;;  %s912_s2 = sshll.u32 %s2149_s11, 4  ;;  %s2201_s2 = int_to_ptr.vmem [resolvable:$true] %s912_s2 }
 0x4bd   : > { %s1672_s19 = scalar_lea.vmem %s2201_s2, 256  ;;  %s1794_s17 = smov [#allocation14]  }
 0x4be   : > { %p1673_p8 = scmp.ne.s32.totalorder %s2201_s2, %s1672_s19  ;;  %s1676_s21 = sshll.u32 %s1794_s17, 4  ;;  %s1677_s21 = int_to_ptr.vmem [resolvable:$false] %s1676_s21 }
 0x4bf   : > { %s1678_s4 = scalar_lea.vmem %s1677_s21, 512  ;;  %p1679_p3 = scmp.lt.s32.totalorder %s2201_s2, %s1677_s21 }
 0x4c0   : > { %p1674_p6 = pnand %p1673_p8, %p2006_p5  ;;  %p1680_p9 = scmp.lt.s32.totalorder %s1678_s4, %s1672_s19 }
 0x4c2   : > { %s2198_s25 = scalar_lea.hbm %s2337_s30, %s2154_s28  ;;  %p1675_p0 = pneg %p1674_p6 }
 0x4c3   : > { %p1681_p12 = por %p1680_p9, %p1679_p3 }
 0x4c5   : > { %p1682_p10 = pnand %p1681_p12, %p1675_p0 }
 0x4c7   : > { %1685 = shalt.err (!%p1682_p10)
}
 0x4c8   : > { %s1686_s11 = scalar_lea.hbm %s2198_s25, 256  ;;  %s1690_s24 = scalar_lea.hbm %s2337_s30, 1024 }
 0x4c9   : > { %p1687_p7 = scmp.ne.s32.totalorder %s2198_s25, %s1686_s11  ;;  %p1691_p2 = scmp.lt.u32.totalorder %s2198_s25, %s2337_s30 }
 0x4ca   : > { %p1692_p4 = scmp.lt.u32.totalorder %s1690_s24, %s1686_s11  ;;  %p1694_p8 = scmp.lt.u32.totalorder %s1686_s11, %s2198_s25 }
 0x4cb   : > { %p1688_p11 = pnand %p1687_p7, %p2006_p5 }
 0x4cc   : > { %p1693_p13 = por %p1692_p4, %p1691_p2 }
 0x4cd   : > { %p1689_p1 = pneg %p1688_p11 }
 0x4ce   : > { %p1695_p6 = por %p1694_p8, %p1693_p13 }
 0x4d0   : > { %p1696_p0 = pnand %p1695_p6, %p1689_p1 }
 0x4d2   : > { %1699 = shalt.err (!%p1696_p0)
}
 0x4d3   : > { %1410 = dma.vmem_to_hbm [thread:$0]  (%p2006_p5), %s2201_s2, 256, %s2198_s25, %s2167_s8, %s1792_s12, %s1792_s12, %s1793_s22   ;;  %v837_v7 = vcvt.f32.s32 %v2142_v53  ;;  %v851_v10 = vcvt.f32.s32 %v2145_v56 }
 0x4d4   : > { %s464_s29 = scalar_lea.vmem [#allocation11], %s2101_s27  ;;  %s2338_s2 = sld [smem:[#allocation28_spill]] }
 0x4d5   : > { %v838_v9 = vshll.u32 %v837_v7, 16  ;;  %s880_s26 = sshll.u32 %s464_s29, 4  ;;  %v852_v14 = vshll.u32 %v851_v10, 16  ;;  %s857_s17 = scalar_lea.sflag [#allocation4], %s2098_s13  ;;  %s2231_s26 = int_to_ptr.vmem [resolvable:$true] %s880_s26 }
 0x4d6   : > { %s1700_s27 = scalar_lea.vmem %s2231_s26, 256  ;;  %s1795_s21 = smov [#allocation11]  }
 0x4d7   : > { %p1701_p3 = scmp.ne.s32.totalorder %s2231_s26, %s1700_s27  ;;  %s1704_s4 = sshll.u32 %s1795_s21, 4  ;;  %s1705_s4 = int_to_ptr.vmem [resolvable:$false] %s1704_s4 }
 0x4d8   : > { %s1706_s11 = scalar_lea.vmem %s1705_s4, 512  ;;  %p1707_p10 = scmp.lt.s32.totalorder %s2231_s26, %s1705_s4 }
 0x4d9   : > { %p1702_p9 = pnand %p1701_p3, %p2006_p5  ;;  %p1708_p7 = scmp.lt.s32.totalorder %s1706_s11, %s1700_s27 }
 0x4da   : > { %s2237_s19 = scalar_lea.hbm %s2338_s2, %s2154_s28 }
 0x4db   : > { %p1703_p12 = pneg %p1702_p9  ;;  %p1709_p11 = por %p1708_p7, %p1707_p10 }
 0x4dd   : > { %p1710_p1 = pnand %p1709_p11, %p1703_p12 }
 0x522   : > { %v835_v8 = vpop.xlane.xlu0 %834 }
 0x523   : > { %v836_v11 = vcvt.f32.s32 %v835_v8 }
 0x525   : > { %v839_v12 = vadd.s32 %v838_v9, %v836_v11 }
 0x526   : > { %v849_v13 = vpop.xlane.xlu1 %848 }
 0x527   : > { %854 = vst [vmem:[%s464_s29] sm:$0xff] %v839_v12  ;;  %v850_v15 = vcvt.f32.s32 %v849_v13 }
 0x529   : > { %v853_v16 = vadd.s32 %v852_v14, %v850_v15 }
 0x52b   : > { %855 = vst [vmem:[%s464_s29 + $0x8] sm:$0xff] %v853_v16 }
 0x52c   : > { %1713 = shalt.err (!%p1710_p1)
}
 0x52d   : > { %s1714_s28 = scalar_lea.hbm %s2237_s19, 256  ;;  %s1718_s24 = scalar_lea.hbm %s2338_s2, 1024 }
 0x52e   : > { %p1715_p2 = scmp.ne.s32.totalorder %s2237_s19, %s1714_s28  ;;  %p1719_p8 = scmp.lt.u32.totalorder %s2237_s19, %s2338_s2 }
 0x52f   : > { %p1720_p6 = scmp.lt.u32.totalorder %s1718_s24, %s1714_s28  ;;  %p1722_p3 = scmp.lt.u32.totalorder %s1714_s28, %s2237_s19 }
 0x530   : > { %p1716_p4 = pnand %p1715_p2, %p2006_p5 }
 0x531   : > { %p1721_p0 = por %p1720_p6, %p1719_p8 }
 0x532   : > { %p1717_p13 = pneg %p1716_p4 }
 0x533   : > { %p1723_p9 = por %p1722_p3, %p1721_p0 }
 0x535   : > { %p1724_p12 = pnand %p1723_p9, %p1717_p13 }
 0x537   : > { %1727 = shalt.err (!%p1724_p12)
}
 0x538   : > { %1408 = dma.vmem_to_hbm [thread:$0]  (%p2006_p5), %s2231_s26, 256, %s2237_s19, %s857_s17, %s1792_s12, %s1792_s12, %s1793_s22  }
 0x539 PF: > { %s2339_s29 = sld [smem:[#allocation21_spill]]  ;;  %s2340_s8 = sld [smem:[#allocation22_spill]] }
 0x53a   : > { %p1448_p10 = scmp.ge.s32.totalorder %s1782_s16, 2 }
 0x53f   : > { %s927_s25 = sand.u32 1, %s2339_s29   ;;  %p2341_p7 = scmp.ne.s32.totalorder %s2340_s8, 0 }
 0x540   : > { %s928_s27 = scalar_lea.sflag [#allocation4], %s927_s25 }
 0x541   : > { %p1432_p11 = pnand %p1448_p10, %p2341_p7 }
 0x543   : > { %1761 = dma.done.wait (!%p1432_p11), %s928_s27, 256  }
 0x544   : > { %1763 = vsyncadd (!%p1432_p11), %s928_s27, 4294967040  ;;  %s2342_s20 = sadd.s32 4294967294, %s1782_s16  }
 0x545   : > { %s936_s21 = sand.u32 1, %s2342_s20  }
 0x546   : > { %s937_s4 = scalar_lea.sflag [#allocation13], %s936_s21 }
 0x547   : > { %1765 = dma.done.wait (!%p1432_p11), %s937_s4, 512  }
 0x548   : > { %1767 = vsyncadd (!%p1432_p11), %s937_s4, 4294966784  ;;  %s2343_s12 = sld [smem:[#allocation23_spill]]  ;;  %p31_p5 = scmp.ge.s32.totalorder %s1992_s18, 6  }
 0x549   : > { %s2344_s13 = smov %s1774_s14  ;;  %s2345_s14 = smov %s1778_s15 }
 0x54a   : > { %s2347_s16 = smov %s1992_s18  ;;  %33 = sbr.rel (!%p31_p5) target bundleno = 17 (0x11), region = 154 }
 0x54e   : > { %s2346_s15 = smov %s2343_s12 }
 0x551   :  { %951 = vsyncpa [#allocation3], 1 }
 0x552   :  { %953 = vsyncpa [#allocation3 + $0x1], 1 }
 0x553   :  { %954 = vsyncpa [#allocation6], 1 }
 0x554   :  { %956 = vsyncpa [#allocation6 + $0x1], 1 }
 0x555   :  { %957 = vsyncpa [#allocation9], 1 }
 0x556   :  { %958 = vsyncpa [#allocation4], 1 }
 0x557   :  { %960 = vsyncpa [#allocation4 + $0x1], 1 }
 0x558   :  { %961 = vsyncpa [#allocation13], 1 }
 0x559   :  { %963 = vsyncpa [#allocation13 + $0x1], 1 }

</bundles_post_ra>
